<compile_context>
chip_gen: v6e
topology: v6e:2x2x1
jax: 0.10.0
libtpu: 0.0.40
codegen_flags: <defaults>
</compile_context>

<pallas_src>
import functools

import jax
import jax.numpy as jnp
from jax.experimental import pallas as pl
from jax.experimental.pallas import tpu as pltpu

NEG_SLOPE = 0.2     # leaky_relu negative_slope
LN_EPS = 1e-5       # nn.LayerNorm default eps
NEG_INF = -1e30     # finite "-inf" so m_prev - m_new never produces NaN

# Matmuls kept in f32 to preserve the PyTorch module's f32 numerics exactly.
# (Switching both operands to bfloat16 here roughly doubles MXU throughput if
#  relaxed numerics are acceptable.)


# --------------------------------------------------------------------------
# Kernel 1: fused projection  feat = x @ W2,  W2 = (F_in, H*D)
# --------------------------------------------------------------------------
def proj_kernel(x_ref, w_ref, o_ref):
    o_ref[...] = jnp.dot(
        x_ref[...], w_ref[...], preferred_element_type=jnp.float32
    ).astype(o_ref.dtype)


def project(x, w2, *, tn=128):
    N, F_in = x.shape
    HD = w2.shape[1]
    tn = min(tn, N)
    assert N % tn == 0, "node count must be divisible by the row tile"
    return pl.pallas_call(
        proj_kernel,
        out_shape=jax.ShapeDtypeStruct((N, HD), jnp.float32),
        grid_spec=pltpu.PrefetchScalarGridSpec(
            num_scalar_prefetch=0,
            grid=(N // tn,),
            in_specs=[
                pl.BlockSpec((tn, F_in), lambda i: (i, 0)),
                pl.BlockSpec((F_in, HD), lambda i: (0, 0)),
            ],
            out_specs=pl.BlockSpec((tn, HD), lambda i: (i, 0)),
        ),
        compiler_params=pltpu.CompilerParams(dimension_semantics=("parallel",)),
    )(x, w2)


# --------------------------------------------------------------------------
# Kernel 2: attention + aggregation (+ residual + ELU [+ LayerNorm + ReLU])
#   grid = (dst tiles [parallel], src tiles [arbitrary / reduction])
# --------------------------------------------------------------------------
def gatv2_attn_kernel(a_ref, fd_ref, fs_ref, adj_ref, *args,
                      H, D, has_residual, apply_ln):
    # Unpack optional inputs, output, scratch.
    i = 0
    res_ref = g_ref = b_ref = None
    if has_residual:
        res_ref = args[i]; i += 1
    if apply_ln:
        g_ref, b_ref = args[i], args[i + 1]; i += 2
    o_ref, m_scr, l_scr, acc_scr = args[i], args[i + 1], args[i + 2], args[i + 3]

    u = pl.program_id(1)

    @pl.when(u == 0)
    def _init():
        m_scr[...] = jnp.full(m_scr.shape, NEG_INF, m_scr.dtype)
        l_scr[...] = jnp.zeros(l_scr.shape, l_scr.dtype)
        acc_scr[...] = jnp.zeros(acc_scr.shape, acc_scr.dtype)

    feat_d = fd_ref[...]            # (Tv, H*D) f32, dst features
    feat_s = fs_ref[...]            # (Tu, H*D) f32, src features
    featT_s = feat_s.T              # (H*D, Tu): one XLU transpose per tile pair
    mask = adj_ref[...] > 0         # (Tv, Tu) bool, int8 adjacency

    for h in range(H):              # heads fused per node tile (static unroll)
        c0 = h * D
        # ---- scores: src axis on 128 lanes, D accumulated on the VPU ----
        e = None
        for d in range(D):          # short fixed loop, fully unrolled
            c = c0 + d
            a_c = a_ref[c]                                       # SMEM scalar
            t = feat_d[:, c:c + 1] + featT_s[c:c + 1, :]         # (Tv, Tu)
            t = jnp.maximum(t, NEG_SLOPE * t)                    # leaky_relu
            e = a_c * t if e is None else e + a_c * t
        e = jnp.where(mask, e, NEG_INF)

        # ---- online (flash-style) masked softmax update ----
        m_prev = m_scr[:, h:h + 1]                               # (Tv, 1)
        m_new = jnp.maximum(m_prev, jnp.max(e, axis=-1, keepdims=True))
        corr = jnp.exp(m_prev - m_new)
        p = jnp.where(mask, jnp.exp(e - m_new), 0.0)             # (Tv, Tu)
        l_scr[:, h:h + 1] = corr * l_scr[:, h:h + 1] + jnp.sum(p, axis=-1,
                                                               keepdims=True)
        agg = jnp.dot(p, feat_s[:, c0:c0 + D],
                      preferred_element_type=jnp.float32)        # (Tv, D) on MXU
        acc_scr[:, c0:c0 + D] = corr * acc_scr[:, c0:c0 + D] + agg
        m_scr[:, h:h + 1] = m_new

    # ---- finalize on the last src tile: normalize, residual, ELU, (LN+ReLU) ----
    @pl.when(u == pl.num_programs(1) - 1)
    def _finalize():
        for h in range(H):
            c0 = h * D
            # one divide per dst row per head (guarded against zero in-degree)
            inv = 1.0 / jnp.maximum(l_scr[:, h:h + 1], 1e-30)
            acc_scr[:, c0:c0 + D] = acc_scr[:, c0:c0 + D] * inv
        out = acc_scr[...]                                       # (Tv, H*D)
        if has_residual:
            out = out + res_ref[...]                             # identity res_fc
        # ELU
        out = jnp.where(out > 0, out, jnp.exp(jnp.minimum(out, 0.0)) - 1.0)
        if apply_ln:
            mean = jnp.mean(out, axis=-1, keepdims=True)
            xc = out - mean
            var = jnp.mean(xc * xc, axis=-1, keepdims=True)
            out = xc * jax.lax.rsqrt(var + LN_EPS) * g_ref[...] + b_ref[...]
            out = jnp.maximum(out, 0.0)                          # ReLU
        o_ref[...] = out.astype(o_ref.dtype)                     # lane-dense store


def gatv2_attention(feat, attn_flat, adj, res=None, ln=None, *,
                    H, D, tv=128, tu=128):
    N, HD = feat.shape
    assert HD == H * D
    tv = min(tv, N)
    tu = min(tu, N)
    assert N % tv == 0 and N % tu == 0, "node count must be divisible by tiles"
    has_residual = res is not None
    apply_ln = ln is not None

    in_specs = [
        pl.BlockSpec(memory_space=pltpu.MemorySpace.SMEM),   # attention vec (H*D,)
        pl.BlockSpec((tv, HD), lambda v, u: (v, 0)),         # dst feature tile
        pl.BlockSpec((tu, HD), lambda v, u: (u, 0)),         # src feature tile
        pl.BlockSpec((tv, tu), lambda v, u: (v, u)),         # int8 adjacency tile
    ]
    inputs = [attn_flat, feat, feat, adj]
    if has_residual:
        in_specs.append(pl.BlockSpec((tv, HD), lambda v, u: (v, 0)))
        inputs.append(res)
    if apply_ln:
        gamma, beta = ln
        in_specs.append(pl.BlockSpec((1, HD), lambda v, u: (0, 0)))
        in_specs.append(pl.BlockSpec((1, HD), lambda v, u: (0, 0)))
        inputs.append(gamma.reshape(1, HD))
        inputs.append(beta.reshape(1, HD))

    kernel = functools.partial(gatv2_attn_kernel, H=H, D=D,
                               has_residual=has_residual, apply_ln=apply_ln)

    return pl.pallas_call(
        kernel,
        out_shape=jax.ShapeDtypeStruct((N, HD), jnp.float32),
        grid_spec=pltpu.PrefetchScalarGridSpec(
            num_scalar_prefetch=0,
            grid=(N // tv, N // tu),       # (dst tiles, src tiles)
            in_specs=in_specs,
            out_specs=pl.BlockSpec((tv, HD), lambda v, u: (v, 0)),
            scratch_shapes=[
                pltpu.VMEM((tv, H), jnp.float32),    # running max per head
                pltpu.VMEM((tv, H), jnp.float32),    # running denom per head
                pltpu.VMEM((tv, HD), jnp.float32),   # running numerator (lane dense)
            ],
        ),
        compiler_params=pltpu.CompilerParams(
            dimension_semantics=("parallel", "arbitrary")),
    )(*inputs)


# --------------------------------------------------------------------------
# Layer / model wrappers
# --------------------------------------------------------------------------
def gatv2_layer(h, W, attn, adj, residual, ln=None):
    H, F_in, D = W.shape
    HD = H * D
    # fused projection: single (N, F_in) x (F_in, H*D) matmul, shared by all heads
    W2 = jnp.transpose(W, (1, 0, 2)).reshape(F_in, HD)
    feat = project(h, W2)
    res = None
    if residual:
        assert F_in == HD, "identity residual requires in_feats == heads*out_feats"
        res = h
    return gatv2_attention(feat, attn.reshape(HD), adj, res, ln, H=H, D=D)


def gatv2_forward(params, adj_list, x):
    """GATv2.forward: GATv2Conv stack; LayerNorm+ReLU fused into all but last layer."""
    h = x
    L = len(params["layers"])
    for l, lp in enumerate(params["layers"]):
        ln = None
        if l != L - 1:
            lnp = params["layer_norms"][l]
            ln = (lnp["gamma"], lnp["beta"])
        h = gatv2_layer(h, lp["W"], lp["attn"], adj_list[l], lp["residual"], ln)
    return h


# --------------------------------------------------------------------------
# Pure-JAX reference (same math) for a correctness check
# --------------------------------------------------------------------------
def ref_forward(params, adj_list, x):
    h = x
    L = len(params["layers"])
    for l, lp in enumerate(params["layers"]):
        W, attn = lp["W"], lp["attn"]
        H, F_in, D = W.shape
        N = h.shape[0]
        feat = jnp.einsum("nf,hfd->nhd", h, W)                       # (N, H, D)
        z = feat[None, :, :, :] + feat[:, None, :, :]                # (Nd, Ns, H, D)
        z = jnp.where(z > 0, z, NEG_SLOPE * z)
        e = jnp.einsum("vuhd,hd->vuh", z, attn[:, 0, :])
        mask = (adj_list[l] > 0)[:, :, None]
        e = jnp.where(mask, e, -1e30)
        e = e - e.max(axis=1, keepdims=True)
        p = jnp.where(mask, jnp.exp(e), 0.0)
        alpha = p / p.sum(axis=1, keepdims=True)
        agg = jnp.einsum("vuh,uhd->vhd", alpha, feat)
        if lp["residual"]:
            agg = agg + h.reshape(N, H, D)
        rst = jnp.where(agg > 0, agg, jnp.exp(agg) - 1.0)
        h = rst.reshape(N, H * D)
        if l != L - 1:
            ln = params["layer_norms"][l]
            mean = h.mean(-1, keepdims=True)
            var = ((h - mean) ** 2).mean(-1, keepdims=True)
            h = (h - mean) / jnp.sqrt(var + LN_EPS) * ln["gamma"] + ln["beta"]
            h = jnp.maximum(h, 0.0)
    return h


# --------------------------------------------------------------------------
# Deterministic parameter init
# --------------------------------------------------------------------------
def init_params(key, in_size, hid_size, heads, num_layers):
    layers, layer_norms = [], []
    dims = [in_size] + [hid_size * heads[l] for l in range(num_layers - 1)]
    for l in range(num_layers):
        f_in, H, D = dims[l], heads[l], hid_size
        key, k1, k2 = jax.random.split(key, 3)
        W = jax.random.normal(k1, (H, f_in, D), jnp.float32) * (1.0 / jnp.sqrt(f_in))
        attn = jax.random.normal(k2, (H, 1, D), jnp.float32) * 0.1
        layers.append({"W": W, "attn": attn, "residual": l > 0})
        if l < num_layers - 1:
            F = hid_size * heads[l]
            layer_norms.append({"gamma": jnp.ones((F,), jnp.float32),
                                "beta": jnp.zeros((F,), jnp.float32)})
    return {"layers": layers, "layer_norms": layer_norms}


# --------------------------------------------------------------------------
if __name__ == "__main__":
    N = 256           # nodes per block (src == dst for simplicity) -> 2x2 tile grid
    in_size = 64
    hid_size = 32
    heads = (4, 4)    # H * D = 128 (lane-dense)
    num_layers = 2

    key = jax.random.PRNGKey(0)
    key, kx, ka0, ka1 = jax.random.split(key, 4)

    x = jax.random.normal(kx, (N, in_size), jnp.float32)

    # Dense int8 adjacency per layer: random edges + self-loops.
    def make_adj(k):
        a = jax.random.uniform(k, (N, N)) < 0.05
        a = jnp.logical_or(a, jnp.eye(N, dtype=bool))
        return a.astype(jnp.int8)
    adj_list = [make_adj(ka0), make_adj(ka1)]

    params = init_params(key, in_size, hid_size, heads, num_layers)

    out = gatv2_forward(params, adj_list, x)
    out = jax.block_until_ready(out)

    ref = ref_forward(params, adj_list, x)
    assert out.shape == (N, hid_size * heads[-1])
    assert jnp.allclose(out, ref, rtol=1e-3, atol=1e-3), "mismatch vs. reference"

    print("KERNEL_OK")
</pallas_src>

<mosaic_0001>
module attributes {stable_mosaic.version = 11 : i64} {
  func.func @proj_kernel(%arg0: i32, %arg1: memref<128x64xf32, #tpu.memory_space<vmem>>, %arg2: memref<64x128xf32, #tpu.memory_space<vmem>>, %arg3: memref<128x128xf32, #tpu.memory_space<vmem>>) attributes {dimension_semantics = [#tpu.dimension_semantics<parallel>], iteration_bounds = array<i64: 2>, scalar_prefetch = 0 : i64, scratch_operands = 0 : i64, tpu.core_type = #tpu.core_type<tc>, window_params = [{transform_indices = @transform_0, window_bounds = array<i64: 128, 64>}, {pipeline_mode = #tpu.pipeline_mode<synchronous>, transform_indices = @transform_1, window_bounds = array<i64: 64, 128>}, {transform_indices = @transform_2, window_bounds = array<i64: 128, 128>}]} {
    %c0 = arith.constant 0 : index
    %c0_0 = arith.constant 0 : index
    %0 = vector.load %arg1[%c0, %c0_0] : memref<128x64xf32, #tpu.memory_space<vmem>>, vector<128x64xf32>
    %c0_1 = arith.constant 0 : index
    %c0_2 = arith.constant 0 : index
    %1 = vector.load %arg2[%c0_1, %c0_2] : memref<64x128xf32, #tpu.memory_space<vmem>>, vector<64x128xf32>
    %cst = arith.constant dense<0.000000e+00> : vector<128x128xf32>
    %2 = tpu.matmul %0, %1, %cst {dimension_numbers = #tpu.dot_dimension_numbers<[1], [0], [0], [1], [0, 0, 1, 1], [], []>} : vector<128x64xf32>, vector<64x128xf32>, vector<128x128xf32> -> vector<128x128xf32>
    %c0_3 = arith.constant 0 : index
    %c0_4 = arith.constant 0 : index
    %3 = vector.load %arg3[%c0_3, %c0_4] : memref<128x128xf32, #tpu.memory_space<vmem>>, vector<128x128xf32>
    tpu.vector_store %arg3[%c0_3, %c0_4], %2 {strides = array<i32>} : memref<128x128xf32, #tpu.memory_space<vmem>>, vector<128x128xf32>,
    return
  }
  func.func @transform_0(%arg0: i32) -> (i32, i32) {
    %c0_i32 = arith.constant 0 : i32
    %c0_i32_0 = arith.constant 0 : i32
    return %arg0, %c0_i32 : i32, i32
  }
  func.func @transform_1(%arg0: i32) -> (i32, i32) {
    %c0_i32 = arith.constant 0 : i32
    %c0_i32_0 = arith.constant 0 : i32
    %c0_i32_1 = arith.constant 0 : i32
    return %c0_i32, %c0_i32_0 : i32, i32
  }
  func.func @transform_2(%arg0: i32) -> (i32, i32) {
    %c0_i32 = arith.constant 0 : i32
    %c0_i32_0 = arith.constant 0 : i32
    return %arg0, %c0_i32 : i32, i32
  }
}

</mosaic_0001>

<bundles_post_ra>
// kernel: tpu_custom_call.1
= control target key start
LH: loop header
LB: loop body
LE: loop exit
PB: predicated region body
PF: predicated region fallthrough
CT: control target
= control target key end

     0   :  { %7 = vsyncpa [#allocation3], 0  ;;  %s867_s0 = inlined_call_operand.vmem [shape: f32[256,64], index: 0, kind: input, shape index: {}]   ;;  %s868_s1 = inlined_call_operand.vmem [shape: f32[64,128], index: 1, kind: input, shape index: {}]   ;;  %s869_s2 = inlined_call_operand.hbm [shape: f32[256,128], index: 2, kind: output, shape index: {}]  }
   0x1   :  { %9 = vsyncpa [#allocation3 + $0x1], 0  ;;  %s685_s9 = smov 0   ;;  %s687_s10 = smov 0  }
   0x2   :  { %s689_s11 = smov 0   ;;  %s691_s12 = smov 0  }
   0x3 LB: > { %s706_s13 = sadd.s32 4294967295, %s665_s12   ;;  %s455_s14 = sadd.s32 4294967294, %s665_s12   ;;  %s665_s12 = sphi %s691_s12, %s875_s12   ;;  %s661_s11 = sphi %s689_s11, %s874_s11   ;;  %s657_s10 = sphi %s687_s10, %s873_s10   ;;  %s653_s9 = sphi %s685_s9, %s872_s9  }
   0x4   : > { %s710_s15 = sadd.s32 1, %s665_s12   ;;  %s69_s16 = sadd.s32 1, %s661_s11 }
   0x5   : > { %s66_s17 = ssub.s32 %s665_s12, %s710_s15  ;;  %p79_p0 = scmp.ne.s32.totalorder %s661_s11, %s657_s10 }
   0x6   : > { %p67_p1 = scmp.eq.s32.totalorder %s66_s17, 0  ;;  %p80_p2 = scmp.eq.s32.totalorder %s706_s13, 1 }
   0x7   : > { %p85_p3 = scmp.ne.s32.totalorder %s657_s10, %s653_s9  ;;  %p86_p4 = scmp.eq.s32.totalorder %s455_s14, 1 }
   0x8   : > { %s721_s18 = scalar_select %p67_p1, %s661_s11, %s69_s16  }
   0x9   : > { %p723_p5 = por %p80_p2, %p79_p0  ;;  %p727_p6 = por %p86_p4, %p85_p3 }
   0xa   : > { %p458_p7 = scmp.ge.s32.totalorder %s665_s12, 1  ;;  %p116_p8 = scmp.lt.s32.totalorder %s665_s12, 3 }
   0xc   : > { %p117_p9 = pnand %p458_p7, %p116_p8 }
   0xd   : > { %s460_s25 = sshll.u32 (!%p117_p9), %s706_s13, 4  ;;  %s135_s23 = sand.u32 (!%p117_p9), 1, %s657_s10  }
   0xe   : > { %120 = sbr.rel (%p117_p9) target bundleno = 258 (0x102), region = 28  ;;  %p139_p10 = scmp.lt.s32.totalorder (!%p117_p9), %s460_s25, 31 }
   0xf   : > { %s459_s24 = sshll.u32 (!%p117_p9), %s135_s23, 7  ;;  %s483_s26 = sshll.u32 (!%p117_p9), %s706_s13, 11 }
  0x10   : > { %s817_s30 = scalar_lea.hbm (!%p117_p9), %s869_s2, %s483_s26  ;;  %s827_s13 = scalar_lea.sflag (!%p117_p9), [#allocation3], %s135_s23 }
  0x11   : > { %s667_s4 = smov (!%p117_p9), [#allocation2]  }
  0x12   : > { %s609_s5 = sshll.u32 (!%p117_p9), %s667_s4, 4  ;;  %s610_s5 = int_to_ptr.vmem [resolvable:$false] %s609_s5 }
  0x13   : > { %v168_v0 = vld [vmem:[%s868_s1 + $0x38] sm:$0xff]  ;;  %v167_v1 = vld [vmem:[%s868_s1 + $0x30] sm:$0xff]  ;;  %v166_v2 = vld [vmem:[%s868_s1 + $0x28] sm:$0xff]  ;;  %s877_s25 = smov (!%p139_p10, %s460_s25), 31  ;;  %vm169_vm0 = vcmask 523264  }
  0x14   : > { %508 = vmatprep.subr.mxu0 %v168_v0  ;;  %548 = vmatprep.subr.mxu1 %v168_v0  ;;  %v165_v3 = vld [vmem:[%s868_s1 + $0x20] sm:$0xff]  ;;  %v164_v4 = vld [vmem:[%s868_s1 + $0x18] sm:$0xff]  ;;  %v163_v5 = vld [vmem:[%s868_s1 + $0x10] sm:$0xff]  ;;  %s461_s6 = sshll.u32 %s877_s25, 3  ;;  %s798_s25 = scalar_lea.vmem [#allocation2], %s459_s24 }
  0x15   : > { %509 = vmatpush3.msra.mxu0 %v168_v0  ;;  %556 = vmatpush3.msra.mxu1 %v168_v0  ;;  %v162_v6 = vld [vmem:[%s868_s1 + $0x8] sm:$0xff]  ;;  %s758_s17 = scalar_lea.vmem %s867_s0, %s461_s6  ;;  %v161_v7 = vld [vmem:[%s868_s1] sm:$0xff]  ;;  %s393_s27 = sshll.u32 %s798_s25, 4  ;;  %s819_s27 = int_to_ptr.vmem [resolvable:$true] %s393_s27 }
  0x16   : > { %510 = vmatprep.subr.mxu0 %v167_v1  ;;  %549 = vmatprep.subr.mxu1 %v167_v1  ;;  %v145_v8 = vld [vmem:[%s758_s17] sm:$0xff]  ;;  %v146_v10 = vld [vmem:[%s758_s17 + $0x8] sm:$0xff]  ;;  %v147_v12 = vld [vmem:[%s758_s17 + $0x10] sm:$0xff]  ;;  %s605_s3 = scalar_lea.vmem %s819_s27, 2048  ;;  %s611_s6 = scalar_lea.vmem %s610_s5, 4096 }
  0x17   : > { %511 = vmatpush3.msra.mxu0 %v167_v1  ;;  %557 = vmatpush3.msra.mxu1 %v167_v1  ;;  %v153_v9 = vld [vmem:[%s758_s17 + $0x40] sm:$0xff]  ;;  %v154_v11 = vld [vmem:[%s758_s17 + $0x48] sm:$0xff]  ;;  %v155_v13 = vld [vmem:[%s758_s17 + $0x50] sm:$0xff]  ;;  %p606_p11 = scmp.ne.s32.totalorder %s819_s27, %s605_s3  ;;  %p612_p0 = scmp.lt.s32.totalorder %s819_s27, %s610_s5 }
  0x18   : > { %512 = vmatprep.subr.mxu0 %v166_v2  ;;  %550 = vmatprep.subr.mxu1 %v166_v2  ;;  %v148_v14 = vld [vmem:[%s758_s17 + $0x18] sm:$0xff]  ;;  %v149_v16 = vld [vmem:[%s758_s17 + $0x20] sm:$0xff]  ;;  %v150_v18 = vld [vmem:[%s758_s17 + $0x28] sm:$0xff]  ;;  %p613_p1 = scmp.lt.s32.totalorder %s611_s6, %s605_s3 }
  0x19   : > { %513 = vmatpush3.msra.mxu0 %v166_v2  ;;  %558 = vmatpush3.msra.mxu1 %v166_v2  ;;  %v156_v15 = vld [vmem:[%s758_s17 + $0x58] sm:$0xff]  ;;  %v157_v17 = vld [vmem:[%s758_s17 + $0x60] sm:$0xff]  ;;  %v158_v19 = vld [vmem:[%s758_s17 + $0x68] sm:$0xff]  ;;  %p607_p12 = pnand %p606_p11, %p723_p5 }
  0x1a   : > { %514 = vmatprep.subr.mxu0 %v165_v3  ;;  %551 = vmatprep.subr.mxu1 %v165_v3  ;;  %v151_v20 = vld [vmem:[%s758_s17 + $0x30] sm:$0xff]  ;;  %v152_v22 = vld [vmem:[%s758_s17 + $0x38] sm:$0xff]  ;;  %p614_p2 = por %p613_p1, %p612_p0 }
  0x1b   : > { %515 = vmatpush3.msra.mxu0 %v165_v3  ;;  %559 = vmatpush3.msra.mxu1 %v165_v3  ;;  %v159_v21 = vld [vmem:[%s758_s17 + $0x70] sm:$0xff]  ;;  %v160_v23 = vld [vmem:[%s758_s17 + $0x78] sm:$0xff]  ;;  %p608_p13 = pneg %p607_p12 }
  0x1c   : > { %516 = vmatprep.subr.mxu0 %v164_v4  ;;  %552 = vmatprep.subr.mxu1 %v164_v4 }
  0x1d   : > { %517 = vmatpush3.msra.mxu0 %v164_v4  ;;  %560 = vmatpush3.msra.mxu1 %v164_v4  ;;  %p615_p3 = pnand %p614_p2, %p608_p13 }
  0x1e   : > { %518 = vmatprep.subr.mxu0 %v163_v5  ;;  %553 = vmatprep.subr.mxu1 %v163_v5 }
  0x1f   : > { %519 = vmatpush3.msra.mxu0 %v163_v5  ;;  %561 = vmatpush3.msra.mxu1 %v163_v5 }
  0x20   : > { %520 = vmatprep.subr.mxu0 %v162_v6  ;;  %554 = vmatprep.subr.mxu1 %v162_v6 }
  0x21   : > { %521 = vmatpush3.msra.mxu0 %v162_v6  ;;  %562 = vmatpush3.msra.mxu1 %v162_v6 }
  0x22   : > { %522 = vmatprep.subr.mxu0 %v161_v7  ;;  %555 = vmatprep.subr.mxu1 %v161_v7 }
  0x23   : > { %523 = vmatpush3.msra.mxu0 %v161_v7  ;;  %563 = vmatpush3.msra.mxu1 %v161_v7 }
  0x24   : > { %524 = vmatprep.mubr.msk.f32.mxu0 %vm169_vm0, %v145_v8  ;;  %536 = vmatprep.mubr.msk.f32.mxu1 %vm169_vm0, %v153_v9 }
  0x25   : > { %525 = vmatmul.mubr.msk.f32.vlgmr.msra.gmra.mxu0 %vm169_vm0, %v146_v10  ;;  %537 = vmatmul.mubr.msk.f32.vlgmr.msra.gmra.mxu1 %vm169_vm0, %v154_v11 }
  0x26   : > { %527 = vmatprep.mubr.msk.f32.mxu0 %vm169_vm0, %v147_v12  ;;  %539 = vmatprep.mubr.msk.f32.mxu1 %vm169_vm0, %v155_v13 }
  0x29   : > { %528 = vmatmul.mubr.msk.f32.gmra.mxu0 %vm169_vm0, %v148_v14  ;;  %540 = vmatmul.mubr.msk.f32.gmra.mxu1 %vm169_vm0, %v156_v15 }
  0x2a   : > { %530 = vmatprep.mubr.msk.f32.mxu0 %vm169_vm0, %v149_v16  ;;  %542 = vmatprep.mubr.msk.f32.mxu1 %vm169_vm0, %v157_v17 }
  0x2d   : > { %531 = vmatmul.mubr.msk.f32.gmra.mxu0 %vm169_vm0, %v150_v18  ;;  %543 = vmatmul.mubr.msk.f32.gmra.mxu1 %vm169_vm0, %v158_v19 }
  0x2e   : > { %533 = vmatprep.mubr.msk.f32.mxu0 %vm169_vm0, %v151_v20  ;;  %545 = vmatprep.mubr.msk.f32.mxu1 %vm169_vm0, %v159_v21 }
  0x31   : > { %534 = vmatmul.mubr.msk.f32.gmra.mxu0 %vm169_vm0, %v152_v22  ;;  %546 = vmatmul.mubr.msk.f32.gmra.mxu1 %vm169_vm0, %v160_v23 }
  0xe5   : > { %v526_v24 = vpop.f32.mrf.mxu0  ;;  %v538_v25 = vpop.f32.mrf.mxu1 }
  0xe6   : > { %364 = vst [vmem:[%s798_s25 + $0x8] sm:$0xff] %v526_v24  ;;  %372 = vst [vmem:[%s798_s25 + $0x48] sm:$0xff] %v538_v25 }
  0xe7   : > { %v284_v26 = vpop.f32.mrf.mxu0  ;;  %v324_v27 = vpop.f32.mrf.mxu1 }
  0xe8   : > { %363 = vst [vmem:[%s798_s25] sm:$0xff] %v284_v26  ;;  %371 = vst [vmem:[%s798_s25 + $0x40] sm:$0xff] %v324_v27 }
  0xe9   : > { %v529_v28 = vpop.f32.mrf.mxu0  ;;  %v541_v29 = vpop.f32.mrf.mxu1 }
  0xea   : > { %366 = vst [vmem:[%s798_s25 + $0x18] sm:$0xff] %v529_v28  ;;  %374 = vst [vmem:[%s798_s25 + $0x58] sm:$0xff] %v541_v29 }
  0xeb   : > { %v294_v30 = vpop.f32.mrf.mxu0  ;;  %v334_v31 = vpop.f32.mrf.mxu1 }
  0xec   : > { %365 = vst [vmem:[%s798_s25 + $0x10] sm:$0xff] %v294_v30  ;;  %373 = vst [vmem:[%s798_s25 + $0x50] sm:$0xff] %v334_v31 }
  0xed   : > { %v532_v32 = vpop.f32.mrf.mxu0  ;;  %v544_v33 = vpop.f32.mrf.mxu1 }
  0xee   : > { %368 = vst [vmem:[%s798_s25 + $0x28] sm:$0xff] %v532_v32  ;;  %376 = vst [vmem:[%s798_s25 + $0x68] sm:$0xff] %v544_v33 }
  0xef   : > { %v304_v34 = vpop.f32.mrf.mxu0  ;;  %v344_v35 = vpop.f32.mrf.mxu1 }
  0xf0   : > { %367 = vst [vmem:[%s798_s25 + $0x20] sm:$0xff] %v304_v34  ;;  %375 = vst [vmem:[%s798_s25 + $0x60] sm:$0xff] %v344_v35 }
  0xf1   : > { %v535_v36 = vpop.f32.mrf.mxu0  ;;  %v547_v37 = vpop.f32.mrf.mxu1 }
  0xf2   : > { %370 = vst [vmem:[%s798_s25 + $0x38] sm:$0xff] %v535_v36  ;;  %378 = vst [vmem:[%s798_s25 + $0x78] sm:$0xff] %v547_v37 }
  0xf3   : > { %v314_v38 = vpop.f32.mrf.mxu0  ;;  %v354_v39 = vpop.f32.mrf.mxu1 }
  0xf4   : > { %369 = vst [vmem:[%s798_s25 + $0x30] sm:$0xff] %v314_v38  ;;  %377 = vst [vmem:[%s798_s25 + $0x70] sm:$0xff] %v354_v39 }
  0xf5   : > { %618 = shalt.err (!%p615_p3)
}
  0xf6   : > { %s619_s7 = scalar_lea.hbm %s817_s30, 2048  ;;  %s623_s16 = scalar_lea.hbm %s869_s2, 4096 }
  0xf7   : > { %p620_p4 = scmp.ne.s32.totalorder %s817_s30, %s619_s7  ;;  %p624_p9 = scmp.lt.s32.totalorder %s817_s30, %s869_s2 }
  0xf8   : > { %p625_p10 = scmp.lt.s32.totalorder %s623_s16, %s619_s7 }
  0xf9   : > { %p621_p7 = pnand %p620_p4, %p723_p5 }
  0xfa   : > { %p626_p11 = por %p625_p10, %p624_p9 }
  0xfb   : > { %p622_p8 = pneg %p621_p7 }
  0xfd   : > { %p627_p12 = pnand %p626_p11, %p622_p8 }
  0xff   : > { %630 = shalt.err (!%p627_p12)
}
 0x100   : > { %s668_s22 = smov 128   ;;  %s669_s23 = smov 8  }
 0x101   : > { %564 = dma.vmem_to_hbm [thread:$0]  (%p723_p5), %s819_s27, 2048, %s817_s30, %s827_s13, %s668_s22, %s668_s22, %s669_s23  }
 0x102 PF: > { %p570_p13 = scmp.ge.s32.totalorder %s665_s12, 2  ;;  %s408_s24 = sand.u32 1, %s653_s9  }
 0x103   : > { %s409_s25 = scalar_lea.sflag [#allocation3], %s408_s24 }
 0x104   : > { %p567_p0 = pnand %p570_p13, %p727_p6 }
 0x106   : > { %p568_p1 = pneg %p567_p0 }
 0x108   : > { %648 = dma.done.wait (%p568_p1), %s409_s25, 2048  }
 0x109   : > { %650 = vsyncadd (%p568_p1), %s409_s25, 4294965248  ;;  %p12_p2 = scmp.ge.s32.totalorder %s710_s15, 4   ;;  %s872_s9 = smov %s657_s10 }
 0x10a   : > { %s873_s10 = smov %s661_s11  ;;  %s874_s11 = smov %s721_s18 }
 0x10b   : > { %s875_s12 = smov %s710_s15  ;;  %14 = sbr.rel (!%p12_p2) target bundleno = 3 (0x3), region = 63 }
 0x110   :  { %414 = vsyncpa [#allocation3], 1 }
 0x111   :  { %416 = vsyncpa [#allocation3 + $0x1], 1 }

</bundles_post_ra>
